<compile_context>
chip_gen: v6e
topology: v6e:2x2x1
jax: 0.10.0
libtpu: 0.0.40
codegen_flags: <defaults>
</compile_context>

<pallas_src>
import jax
import jax.numpy as jnp
from jax.experimental import pallas as pl
from jax.experimental.pallas import tpu as pltpu

LANE = 128
SUBLANE = 8


def _round_up(x, m):
    return ((x + m - 1) // m) * m


# ----------------------------------------------------------------------------
# Pallas kernel:
#   out = relu(relu(obs@W1o + act@W1a + clu@W1c + b1) @ W2 + b2) @ W3 + b3
# Feature dims of W2/W3/biases are padded to multiples of 128; matmul
# accumulation and the elementwise epilogue are float32.
# ----------------------------------------------------------------------------
def _mlp_kernel(obs_ref, act_ref, clu_ref,
                w1o_ref, w1a_ref, w1c_ref, b1_ref,
                w2_ref, b2_ref, w3_ref, b3_ref,
                o_ref):
    mxu_dtype = w1o_ref.dtype
    obs = obs_ref[...].astype(mxu_dtype)
    act = act_ref[...].astype(mxu_dtype)
    clu = clu_ref[...].astype(mxu_dtype)

    # Fused "concat": split-K matmul against the row-split W1.
    h1 = (jnp.dot(obs, w1o_ref[...], preferred_element_type=jnp.float32)
          + jnp.dot(act, w1a_ref[...], preferred_element_type=jnp.float32)
          + jnp.dot(clu, w1c_ref[...], preferred_element_type=jnp.float32)
          + b1_ref[...])
    h1 = jnp.maximum(h1, 0.0)

    h2 = jnp.dot(h1.astype(mxu_dtype), w2_ref[...],
                 preferred_element_type=jnp.float32) + b2_ref[...]
    h2 = jnp.maximum(h2, 0.0)

    out = jnp.dot(h2.astype(mxu_dtype), w3_ref[...],
                  preferred_element_type=jnp.float32) + b3_ref[...]
    o_ref[...] = out.astype(o_ref.dtype)  # lane-dense (out_pad = k*128) store


def mlp_pallas(obs2d, act2d, clu2d, p, *, tile_m):
    """Apply the MLP to row-aligned 2D context components.

    obs2d: (n_pad, obs_size), act2d: (n_pad, action_size),
    clu2d: (n_pad, rep_size); n_pad must be a multiple of tile_m.
    Returns (n_pad, out_pad) float32; caller slices [:n_rows, :obs_size].
    """
    n_pad, obs_size = obs2d.shape
    act_size = act2d.shape[1]
    rep_size = clu2d.shape[1]
    h_pad = p["w2"].shape[0]
    out_pad = p["w3"].shape[1]
    assert n_pad % tile_m == 0

    grid = (n_pad // tile_m,)
    row = lambda i: (i, 0)     # tiled over rows
    rep = lambda i: (0, 0)     # weights/biases: single VMEM-resident block

    return pl.pallas_call(
        _mlp_kernel,
        out_shape=jax.ShapeDtypeStruct((n_pad, out_pad), jnp.float32),
        grid=grid,
        in_specs=[
            pl.BlockSpec((tile_m, obs_size), row),
            pl.BlockSpec((tile_m, act_size), row),
            pl.BlockSpec((tile_m, rep_size), row),
            pl.BlockSpec((obs_size, h_pad), rep),
            pl.BlockSpec((act_size, h_pad), rep),
            pl.BlockSpec((rep_size, h_pad), rep),
            pl.BlockSpec((1, h_pad), rep),
            pl.BlockSpec((h_pad, h_pad), rep),
            pl.BlockSpec((1, h_pad), rep),
            pl.BlockSpec((h_pad, out_pad), rep),
            pl.BlockSpec((1, out_pad), rep),
        ],
        out_specs=pl.BlockSpec((tile_m, out_pad), row),
        compiler_params=pltpu.CompilerParams(
            dimension_semantics=("parallel",)),
    )(obs2d, act2d, clu2d,
      p["w1_obs"], p["w1_act"], p["w1_clu"], p["b1"],
      p["w2"], p["b2"], p["w3"], p["b3"])


# ----------------------------------------------------------------------------
# get_past_indices: random index into the (left-padded) past for each step.
# TODO(synk): exact torch.randint bit-stream is not reproducible in JAX; the
# distribution / support (rand % max(step - pad, 1) + pad) matches PyTorch.
# ----------------------------------------------------------------------------
def get_past_indices(key, bsz, t, seq_len):
    rand = jax.random.randint(key, (bsz, t), 0, t)
    steps = jnp.broadcast_to(jnp.arange(t)[None, :], (bsz, t))
    pads = (t - seq_len).reshape(bsz, 1)            # left-padding length per batch
    ranges = jnp.maximum(steps - pads, 1)           # number of valid past steps
    idxs = rand % ranges + pads
    return idxs.astype(jnp.int32)


# ----------------------------------------------------------------------------
# Parameter preparation: split W1 by input component, zero-pad hidden / out
# feature dims to multiples of 128, cast MXU operands to mxu_dtype (biases
# stay f32).  Done once, outside the hot path.
# ----------------------------------------------------------------------------
def prepare_params(raw, obs_size, action_size, rep_size,
                   *, mxu_dtype=jnp.bfloat16):
    hidden = raw["w1"].shape[1]
    out_dim = raw["w3"].shape[1]
    h_pad = _round_up(hidden, LANE)
    out_pad = _round_up(out_dim, LANE)

    w1 = raw["w1"]                                  # (obs+act+rep, hidden)
    w1_obs = w1[:obs_size]
    w1_act = w1[obs_size:obs_size + action_size]
    w1_clu = w1[obs_size + action_size:]

    def padw(w, rows, cols):
        return jnp.pad(w, ((0, rows - w.shape[0]),
                           (0, cols - w.shape[1]))).astype(mxu_dtype)

    def padb(b, cols):
        b = b.reshape(1, -1)
        return jnp.pad(b, ((0, 0), (0, cols - b.shape[1]))).astype(jnp.float32)

    return {
        "w1_obs": padw(w1_obs, obs_size, h_pad),
        "w1_act": padw(w1_act, action_size, h_pad),
        "w1_clu": padw(w1_clu, rep_size, h_pad),
        "b1": padb(raw["b1"], h_pad),
        "w2": padw(raw["w2"], h_pad, h_pad),
        "b2": padb(raw["b2"], h_pad),
        "w3": padw(raw["w3"], h_pad, out_pad),
        "b3": padb(raw["b3"], out_pad),
    }


# ----------------------------------------------------------------------------
# DynamicsModel forward
# ----------------------------------------------------------------------------
def dynamics_model_forward(params, obs, action, cluster, seq_len, idx_key,
                           *, max_tile_m=1024):
    bsz, t = obs.shape[:2]
    obs = obs.reshape(bsz, t, -1)
    obs_dim = obs.shape[-1]

    idxs = get_past_indices(idx_key, bsz, t, seq_len)          # (bsz, t)
    # torch.gather(cluster, 1, idxs.expand(bsz, t, rep_size))
    past_cluster = jnp.take_along_axis(cluster, idxs[:, :, None], axis=1)

    obs_ctx = obs[:, :-1]
    act_ctx = action[:, :-1]
    clu_ctx = past_cluster[:, :-1]
    next_obs = obs[:, 1:]

    n_rows = bsz * (t - 1)
    tile_m = min(max_tile_m, _round_up(n_rows, SUBLANE))
    n_pad = _round_up(n_rows, tile_m)

    def to2d(a):
        a2 = a.reshape(n_rows, a.shape[-1])
        if n_pad != n_rows:
            a2 = jnp.pad(a2, ((0, n_pad - n_rows), (0, 0)))
        return a2

    pred = mlp_pallas(to2d(obs_ctx), to2d(act_ctx), to2d(clu_ctx),
                      params, tile_m=tile_m)
    pred_next_obs = pred[:n_rows, :obs_dim].reshape(next_obs.shape)
    return pred_next_obs, next_obs


# ----------------------------------------------------------------------------
# Pure-JAX reference (unpadded, single concat + 3-layer ReLU MLP) for checking.
# ----------------------------------------------------------------------------
def dynamics_model_reference(raw, obs, action, cluster, seq_len, idx_key):
    bsz, t = obs.shape[:2]
    obs = obs.reshape(bsz, t, -1)
    idxs = get_past_indices(idx_key, bsz, t, seq_len)
    past_cluster = jnp.take_along_axis(cluster, idxs[:, :, None], axis=1)
    x = jnp.concatenate([obs, action], axis=-1)
    context = jnp.concatenate([x[:, :-1], past_cluster[:, :-1]], axis=-1)
    next_obs = obs[:, 1:]
    c = context.reshape(bsz * (t - 1), -1)
    h1 = jnp.maximum(c @ raw["w1"] + raw["b1"], 0.0)
    h2 = jnp.maximum(h1 @ raw["w2"] + raw["b2"], 0.0)
    out = h2 @ raw["w3"] + raw["b3"]
    return out.reshape(next_obs.shape), next_obs


# ----------------------------------------------------------------------------
# Deterministic parameter init (MLP: in -> hidden -> hidden -> obs_size),
# stored unpadded / unsplit in (in, out) layout like the PyTorch Linear^T.
# ----------------------------------------------------------------------------
def init_params(key, in_dim, hidden, out_dim):
    ks = jax.random.split(key, 3)

    def lin(kw, fan_in, fan_out):
        scale = 1.0 / jnp.sqrt(fan_in)
        return jax.random.uniform(kw, (fan_in, fan_out), jnp.float32, -scale, scale)

    return {
        "w1": lin(ks[0], in_dim, hidden),
        "b1": jnp.zeros((1, hidden), jnp.float32),
        "w2": lin(ks[1], hidden, hidden),
        "b2": jnp.zeros((1, hidden), jnp.float32),
        "w3": lin(ks[2], hidden, out_dim),
        "b3": jnp.zeros((1, out_dim), jnp.float32),
    }


if __name__ == "__main__":
    key = jax.random.PRNGKey(0)
    k_obs, k_act, k_clu, k_idx, k_par = jax.random.split(key, 5)

    bsz, t = 2, 8
    obs_size, action_size, rep_size, hidden = 16, 4, 8, 32
    in_dim = obs_size + action_size + rep_size

    obs = jax.random.normal(k_obs, (bsz, t, obs_size), jnp.float32)
    action = jax.random.normal(k_act, (bsz, t, action_size), jnp.float32)
    cluster = jax.random.normal(k_clu, (bsz, t, rep_size), jnp.float32)
    seq_len = jnp.array([t, t - 2], dtype=jnp.int32)   # per-batch sequence lengths

    raw_params = init_params(k_par, in_dim, hidden, obs_size)

    fwd = jax.jit(dynamics_model_forward)

    # Production path: bf16 MXU operands, f32 accumulation.
    params_bf16 = prepare_params(raw_params, obs_size, action_size, rep_size,
                                 mxu_dtype=jnp.bfloat16)
    pred_next_obs, next_obs = fwd(params_bf16, obs, action, cluster, seq_len, k_idx)
    jax.block_until_ready((pred_next_obs, next_obs))
    assert pred_next_obs.shape == (bsz, t - 1, obs_size)
    assert next_obs.shape == (bsz, t - 1, obs_size)
    assert bool(jnp.all(jnp.isfinite(pred_next_obs)))

    # Bit-faithful f32 path checked against a pure-JAX reference.
    params_f32 = prepare_params(raw_params, obs_size, action_size, rep_size,
                                mxu_dtype=jnp.float32)
    pred_f32, next_f32 = fwd(params_f32, obs, action, cluster, seq_len, k_idx)
    ref_pred, ref_next = dynamics_model_reference(raw_params, obs, action,
                                                  cluster, seq_len, k_idx)
    jax.block_until_ready((pred_f32, ref_pred))
    assert jnp.allclose(next_f32, ref_next)
    assert jnp.allclose(pred_f32, ref_pred, rtol=1e-3, atol=1e-3)

    print("KERNEL_OK")
</pallas_src>

<mosaic_0001>
module attributes {stable_mosaic.version = 11 : i64} {
  func.func @_mlp_kernel(%arg0: i32, %arg1: memref<16x16xf32, #tpu.memory_space<vmem>>, %arg2: memref<16x4xf32, #tpu.memory_space<vmem>>, %arg3: memref<16x8xf32, #tpu.memory_space<vmem>>, %arg4: memref<16x128xbf16, #tpu.memory_space<vmem>>, %arg5: memref<4x128xbf16, #tpu.memory_space<vmem>>, %arg6: memref<8x128xbf16, #tpu.memory_space<vmem>>, %arg7: memref<1x128xf32, #tpu.memory_space<vmem>>, %arg8: memref<128x128xbf16, #tpu.memory_space<vmem>>, %arg9: memref<1x128xf32, #tpu.memory_space<vmem>>, %arg10: memref<128x128xbf16, #tpu.memory_space<vmem>>, %arg11: memref<1x128xf32, #tpu.memory_space<vmem>>, %arg12: memref<16x128xf32, #tpu.memory_space<vmem>>) attributes {dimension_semantics = [#tpu.dimension_semantics<parallel>], iteration_bounds = array<i64: 1>, scalar_prefetch = 0 : i64, scratch_operands = 0 : i64, tpu.core_type = #tpu.core_type<tc>, window_params = [{transform_indices = @transform_0, window_bounds = array<i64: 16, 16>}, {transform_indices = @transform_1, window_bounds = array<i64: 16, 4>}, {transform_indices = @transform_2, window_bounds = array<i64: 16, 8>}, {pipeline_mode = #tpu.pipeline_mode<synchronous>, transform_indices = @transform_3, window_bounds = array<i64: 16, 128>}, {pipeline_mode = #tpu.pipeline_mode<synchronous>, transform_indices = @transform_4, window_bounds = array<i64: 4, 128>}, {pipeline_mode = #tpu.pipeline_mode<synchronous>, transform_indices = @transform_5, window_bounds = array<i64: 8, 128>}, {pipeline_mode = #tpu.pipeline_mode<synchronous>, transform_indices = @transform_6, window_bounds = array<i64: 1, 128>}, {pipeline_mode = #tpu.pipeline_mode<synchronous>, transform_indices = @transform_7, window_bounds = array<i64: 128, 128>}, {pipeline_mode = #tpu.pipeline_mode<synchronous>, transform_indices = @transform_8, window_bounds = array<i64: 1, 128>}, {pipeline_mode = #tpu.pipeline_mode<synchronous>, transform_indices = @transform_9, window_bounds = array<i64: 128, 128>}, {pipeline_mode = #tpu.pipeline_mode<synchronous>, transform_indices = @transform_10, window_bounds = array<i64: 1, 128>}, {transform_indices = @transform_11, window_bounds = array<i64: 16, 128>}]} {
    %c0 = arith.constant 0 : index
    %c0_0 = arith.constant 0 : index
    %0 = vector.load %arg1[%c0, %c0_0] : memref<16x16xf32, #tpu.memory_space<vmem>>, vector<16x16xf32>
    %1 = arith.truncf %0 : vector<16x16xf32> to vector<16x16xbf16>
    %c0_1 = arith.constant 0 : index
    %c0_2 = arith.constant 0 : index
    %2 = vector.load %arg2[%c0_1, %c0_2] : memref<16x4xf32, #tpu.memory_space<vmem>>, vector<16x4xf32>
    %3 = arith.truncf %2 : vector<16x4xf32> to vector<16x4xbf16>
    %c0_3 = arith.constant 0 : index
    %c0_4 = arith.constant 0 : index
    %4 = vector.load %arg3[%c0_3, %c0_4] : memref<16x8xf32, #tpu.memory_space<vmem>>, vector<16x8xf32>
    %5 = arith.truncf %4 : vector<16x8xf32> to vector<16x8xbf16>
    %c0_5 = arith.constant 0 : index
    %c0_6 = arith.constant 0 : index
    %6 = vector.load %arg4[%c0_5, %c0_6] : memref<16x128xbf16, #tpu.memory_space<vmem>>, vector<16x128xbf16>
    %cst = arith.constant dense<0.000000e+00> : vector<16x128xf32>
    %7 = tpu.matmul %1, %6, %cst {dimension_numbers = #tpu.dot_dimension_numbers<[1], [0], [0], [1], [0, 0, 1, 1], [], []>} : vector<16x16xbf16>, vector<16x128xbf16>, vector<16x128xf32> -> vector<16x128xf32>
    %c0_7 = arith.constant 0 : index
    %c0_8 = arith.constant 0 : index
    %8 = vector.load %arg5[%c0_7, %c0_8] : memref<4x128xbf16, #tpu.memory_space<vmem>>, vector<4x128xbf16>
    %cst_9 = arith.constant dense<0.000000e+00> : vector<16x128xf32>
    %9 = tpu.matmul %3, %8, %cst_9 {dimension_numbers = #tpu.dot_dimension_numbers<[1], [0], [0], [1], [0, 0, 1, 1], [], []>} : vector<16x4xbf16>, vector<4x128xbf16>, vector<16x128xf32> -> vector<16x128xf32>
    %10 = arith.addf %7, %9 : vector<16x128xf32>
    %c0_10 = arith.constant 0 : index
    %c0_11 = arith.constant 0 : index
    %11 = vector.load %arg6[%c0_10, %c0_11] : memref<8x128xbf16, #tpu.memory_space<vmem>>, vector<8x128xbf16>
    %cst_12 = arith.constant dense<0.000000e+00> : vector<16x128xf32>
    %12 = tpu.matmul %5, %11, %cst_12 {dimension_numbers = #tpu.dot_dimension_numbers<[1], [0], [0], [1], [0, 0, 1, 1], [], []>} : vector<16x8xbf16>, vector<8x128xbf16>, vector<16x128xf32> -> vector<16x128xf32>
    %13 = arith.addf %10, %12 : vector<16x128xf32>
    %c0_13 = arith.constant 0 : index
    %c0_14 = arith.constant 0 : index
    %14 = vector.load %arg7[%c0_13, %c0_14] : memref<1x128xf32, #tpu.memory_space<vmem>>, vector<1x128xf32>
    %15 = vector.broadcast %14 : vector<1x128xf32> to vector<16x128xf32>
    %16 = arith.addf %13, %15 : vector<16x128xf32>
    %cst_15 = arith.constant 0.000000e+00 : f32
    %17 = vector.broadcast %cst_15 : f32 to vector<16x128xf32>
    %18 = arith.maximumf %16, %17 : vector<16x128xf32>
    %19 = arith.truncf %18 : vector<16x128xf32> to vector<16x128xbf16>
    %c0_16 = arith.constant 0 : index
    %c0_17 = arith.constant 0 : index
    %20 = vector.load %arg8[%c0_16, %c0_17] : memref<128x128xbf16, #tpu.memory_space<vmem>>, vector<128x128xbf16>
    %cst_18 = arith.constant dense<0.000000e+00> : vector<16x128xf32>
    %21 = tpu.matmul %19, %20, %cst_18 {dimension_numbers = #tpu.dot_dimension_numbers<[1], [0], [0], [1], [0, 0, 1, 1], [], []>} : vector<16x128xbf16>, vector<128x128xbf16>, vector<16x128xf32> -> vector<16x128xf32>
    %c0_19 = arith.constant 0 : index
    %c0_20 = arith.constant 0 : index
    %22 = vector.load %arg9[%c0_19, %c0_20] : memref<1x128xf32, #tpu.memory_space<vmem>>, vector<1x128xf32>
    %23 = vector.broadcast %22 : vector<1x128xf32> to vector<16x128xf32>
    %24 = arith.addf %21, %23 : vector<16x128xf32>
    %cst_21 = arith.constant 0.000000e+00 : f32
    %25 = vector.broadcast %cst_21 : f32 to vector<16x128xf32>
    %26 = arith.maximumf %24, %25 : vector<16x128xf32>
    %27 = arith.truncf %26 : vector<16x128xf32> to vector<16x128xbf16>
    %c0_22 = arith.constant 0 : index
    %c0_23 = arith.constant 0 : index
    %28 = vector.load %arg10[%c0_22, %c0_23] : memref<128x128xbf16, #tpu.memory_space<vmem>>, vector<128x128xbf16>
    %cst_24 = arith.constant dense<0.000000e+00> : vector<16x128xf32>
    %29 = tpu.matmul %27, %28, %cst_24 {dimension_numbers = #tpu.dot_dimension_numbers<[1], [0], [0], [1], [0, 0, 1, 1], [], []>} : vector<16x128xbf16>, vector<128x128xbf16>, vector<16x128xf32> -> vector<16x128xf32>
    %c0_25 = arith.constant 0 : index
    %c0_26 = arith.constant 0 : index
    %30 = vector.load %arg11[%c0_25, %c0_26] : memref<1x128xf32, #tpu.memory_space<vmem>>, vector<1x128xf32>
    %31 = vector.broadcast %30 : vector<1x128xf32> to vector<16x128xf32>
    %32 = arith.addf %29, %31 : vector<16x128xf32>
    %c0_27 = arith.constant 0 : index
    %c0_28 = arith.constant 0 : index
    %33 = vector.load %arg12[%c0_27, %c0_28] : memref<16x128xf32, #tpu.memory_space<vmem>>, vector<16x128xf32>
    tpu.vector_store %arg12[%c0_27, %c0_28], %32 {strides = array<i32>} : memref<16x128xf32, #tpu.memory_space<vmem>>, vector<16x128xf32>,
    return
  }
  func.func @transform_0(%arg0: i32) -> (i32, i32) {
    %c0_i32 = arith.constant 0 : i32
    %c0_i32_0 = arith.constant 0 : i32
    return %arg0, %c0_i32 : i32, i32
  }
  func.func @transform_1(%arg0: i32) -> (i32, i32) {
    %c0_i32 = arith.constant 0 : i32
    %c0_i32_0 = arith.constant 0 : i32
    return %arg0, %c0_i32 : i32, i32
  }
  func.func @transform_2(%arg0: i32) -> (i32, i32) {
    %c0_i32 = arith.constant 0 : i32
    %c0_i32_0 = arith.constant 0 : i32
    return %arg0, %c0_i32 : i32, i32
  }
  func.func @transform_3(%arg0: i32) -> (i32, i32) {
    %c0_i32 = arith.constant 0 : i32
    %c0_i32_0 = arith.constant 0 : i32
    %c0_i32_1 = arith.constant 0 : i32
    return %c0_i32, %c0_i32_0 : i32, i32
  }
  func.func @transform_4(%arg0: i32) -> (i32, i32) {
    %c0_i32 = arith.constant 0 : i32
    %c0_i32_0 = arith.constant 0 : i32
    %c0_i32_1 = arith.constant 0 : i32
    return %c0_i32, %c0_i32_0 : i32, i32
  }
  func.func @transform_5(%arg0: i32) -> (i32, i32) {
    %c0_i32 = arith.constant 0 : i32
    %c0_i32_0 = arith.constant 0 : i32
    %c0_i32_1 = arith.constant 0 : i32
    return %c0_i32, %c0_i32_0 : i32, i32
  }
  func.func @transform_6(%arg0: i32) -> (i32, i32) {
    %c0_i32 = arith.constant 0 : i32
    %c0_i32_0 = arith.constant 0 : i32
    %c0_i32_1 = arith.constant 0 : i32
    return %c0_i32, %c0_i32_0 : i32, i32
  }
  func.func @transform_7(%arg0: i32) -> (i32, i32) {
    %c0_i32 = arith.constant 0 : i32
    %c0_i32_0 = arith.constant 0 : i32
    %c0_i32_1 = arith.constant 0 : i32
    return %c0_i32, %c0_i32_0 : i32, i32
  }
  func.func @transform_8(%arg0: i32) -> (i32, i32) {
    %c0_i32 = arith.constant 0 : i32
    %c0_i32_0 = arith.constant 0 : i32
    %c0_i32_1 = arith.constant 0 : i32
    return %c0_i32, %c0_i32_0 : i32, i32
  }
  func.func @transform_9(%arg0: i32) -> (i32, i32) {
    %c0_i32 = arith.constant 0 : i32
    %c0_i32_0 = arith.constant 0 : i32
    %c0_i32_1 = arith.constant 0 : i32
    return %c0_i32, %c0_i32_0 : i32, i32
  }
  func.func @transform_10(%arg0: i32) -> (i32, i32) {
    %c0_i32 = arith.constant 0 : i32
    %c0_i32_0 = arith.constant 0 : i32
    %c0_i32_1 = arith.constant 0 : i32
    return %c0_i32, %c0_i32_0 : i32, i32
  }
  func.func @transform_11(%arg0: i32) -> (i32, i32) {
    %c0_i32 = arith.constant 0 : i32
    %c0_i32_0 = arith.constant 0 : i32
    return %arg0, %c0_i32 : i32, i32
  }
}

</mosaic_0001>

<bundles_post_ra>
// kernel: dynamics_model_forward.1
= control target key start
LH: loop header
LB: loop body
LE: loop exit
PB: predicated region body
PF: predicated region fallthrough
CT: control target
= control target key end

     0   :  { %vm55_vm0 = vcmask 1041408   ;;  %v572_v0 = vmov 0.0   ;;  %vm573_vm1 = vmmov 0   ;;  %vm156_vm2 = vcmask 1043456   ;;  %s753_s4 = inlined_call_operand.vmem [shape: bf16[4,128], index: 4, kind: input, shape index: {}]   ;;  %s754_s3 = inlined_call_operand.vmem [shape: bf16[16,128], index: 3, kind: input, shape index: {}]   ;;  %s755_s1 = inlined_call_operand.vmem [shape: f32[16,4], index: 1, kind: input, shape index: {}]   ;;  %s756_s0 = inlined_call_operand.vmem [shape: f32[16,16], index: 0, kind: input, shape index: {}]   ;;  %s757_s5 = inlined_call_operand.vmem [shape: bf16[8,128], index: 5, kind: input, shape index: {}]   ;;  %s758_s2 = inlined_call_operand.vmem [shape: f32[16,8], index: 2, kind: input, shape index: {}]   ;;  %s759_s7 = inlined_call_operand.vmem [shape: bf16[128,128], index: 7, kind: input, shape index: {}]   ;;  %s760_s9 = inlined_call_operand.vmem [shape: bf16[128,128], index: 9, kind: input, shape index: {}]   ;;  %s761_s6 = inlined_call_operand.vmem [shape: f32[1,128], index: 6, kind: input, shape index: {}]   ;;  %s762_s8 = inlined_call_operand.vmem [shape: f32[1,128], index: 8, kind: input, shape index: {}]   ;;  %s763_s10 = inlined_call_operand.vmem [shape: f32[1,128], index: 10, kind: input, shape index: {}]   ;;  %s764_s11 = inlined_call_operand.vmem [shape: f32[16,128], index: 11, kind: output, shape index: {}]  }
   0x1   :  { %495 = vmatprep.subr.bf16.mxu0 %v572_v0  ;;  %v50_v1 = vld [vmem:[%s753_s4] sm:$0x3]  ;;  %501 = vmatprep.subr.bf16.mxu1 %v572_v0  ;;  %v43_v5 = vld [vmem:[%s755_s1 + $0x8] sm:$0xff]  ;;  %vm51_vm3 = vcmask 31744   ;;  %vm106_vm4 = vcmask 130048   ;;  %v556_v13 = vld [vmem:[%s759_s7 + $0x38] sm:$0xff]  }
   0x2   :  { %v57_v2 = vsel %vm55_vm0, %v50_v1, 0  ;;  %v555_v3 = vld [vmem:[%s754_s3] sm:$0xff]   ;;  %497 = vmatprep.mubr.msk.bf16.mxu0 %vm573_vm1, %v572_v0  ;;  %503 = vmatprep.mubr.msk.bf16.mxu1 %vm573_vm1, %v572_v0  ;;  %v40_v8 = vld [vmem:[%s756_s0 + $0x8] sm:$0xff]  ;;  %v557_v15 = vld [vmem:[%s759_s7 + $0x30] sm:$0xff]   ;;  %vm152_vm5 = vcmask 64512  }
   0x3   :  { %v42_v4 = vld [vmem:[%s755_s1] sm:$0xff]  ;;  %496 = vmatpush3.bf16.msra.mxu0 %v57_v2  ;;  %502 = vmatpush3.bf16.msra.mxu1 %v555_v3  ;;  %v46_v14 = vld [vmem:[%s758_s2 + $0x8] sm:$0xff]  ;;  %v560_v19 = vld [vmem:[%s759_s7 + $0x18] sm:$0xff]  }
   0x4   :  { %v44_v6 = vpack.c.bf16 %v43_v5, %v42_v4  ;;  %v39_v7 = vld [vmem:[%s756_s0] sm:$0xff]  ;;  %507 = vmatprep.subr.bf16.mxu0 %v572_v0  ;;  %513 = vmatprep.subr.bf16.mxu1 %v572_v0  ;;  %v558_v17 = vld [vmem:[%s759_s7 + $0x28] sm:$0xff]   ;;  %v561_v20 = vld [vmem:[%s759_s7 + $0x10] sm:$0xff]  }
   0x5   :  { %v151_v9 = vld [vmem:[%s757_s5] sm:$0xf]  ;;  %v41_v10 = vpack.c.bf16 %v40_v8, %v39_v7  ;;  %v562_v21 = vld [vmem:[%s759_s7 + $0x8] sm:$0xff]   ;;  %v564_v23 = vld [vmem:[%s760_s9 + $0x38] sm:$0xff]  }
   0x6   :  { %v158_v11 = vsel %vm156_vm2, %v151_v9, 0  ;;  %v45_v12 = vld [vmem:[%s758_s2] sm:$0xff]  ;;  %498 = vmatmul.mubr.msk.bf16.vlgmr.msra.gmra.mxu0 %vm51_vm3, %v44_v6  ;;  %v565_v24 = vld [vmem:[%s760_s9 + $0x30] sm:$0xff]   ;;  %v566_v25 = vld [vmem:[%s760_s9 + $0x28] sm:$0xff]  }
   0x7   :  { %504 = vmatmul.mubr.msk.bf16.vlgmr.msra.gmra.mxu1 %vm106_vm4, %v41_v10  ;;  %508 = vmatpush3.bf16.msra.mxu0 %v158_v11  ;;  %v47_v16 = vpack.c.bf16 %v46_v14, %v45_v12  ;;  %v559_v18 = vld [vmem:[%s759_s7 + $0x20] sm:$0xff]   ;;  %v568_v27 = vld [vmem:[%s760_s9 + $0x18] sm:$0xff]   ;;  %v569_v50 = vld [vmem:[%s760_s9 + $0x10] sm:$0xff]  }
   0x8   :  { %509 = vmatprep.mubr.msk.bf16.mxu0 %vm573_vm1, %v572_v0  ;;  %514 = vmatpush3.bf16.msra.mxu1 %v556_v13  ;;  %v563_v22 = vld [vmem:[%s759_s7] sm:$0xff]   ;;  %v570_v51 = vld [vmem:[%s760_s9 + $0x8] sm:$0xff]  }
   0x9   :  { %515 = vmatprep.subr.bf16.mxu1 %v572_v0  ;;  %529 = vmatprep.mubr.msk.bf16.mxu1 %vm573_vm1, %v572_v0  ;;  %v567_v26 = vld [vmem:[%s760_s9 + $0x20] sm:$0xff]  }
   0xa   :  { %533 = vmatprep.subr.bf16.mxu0 %v572_v0  ;;  %v452_v39 = vld [vmem:[%s761_s6] ss:$0 sm:$0xff] }
   0xb   :  { %v571_v52 = vld [vmem:[%s760_s9] sm:$0xff]  }
   0xc   :  { %516 = vmatpush3.bf16.msra.mxu1 %v557_v15  ;;  %v453_v53 = vld [vmem:[%s762_s8] ss:$0 sm:$0xff] }
   0xd   :  { %517 = vmatprep.subr.bf16.mxu1 %v572_v0  ;;  %v462_v63 = vld [vmem:[%s763_s10] ss:$0 sm:$0xff] }
   0xe   :  { %510 = vmatmul.mubr.msk.bf16.vlgmr.msra.gmra.mxu0 %vm152_vm5, %v47_v16 }
   0xf   :  { %549 = vmatprep.mubr.msk.bf16.mxu0 %vm573_vm1, %v572_v0  ;;  %534 = vmatpush3.bf16.msra.mxu0 %v564_v23 }
  0x10   :  { %518 = vmatpush3.bf16.msra.mxu1 %v558_v17  ;;  %535 = vmatprep.subr.bf16.mxu0 %v572_v0 }
  0x11   :  { %519 = vmatprep.subr.bf16.mxu1 %v572_v0 }
  0x13   :  { %536 = vmatpush3.bf16.msra.mxu0 %v565_v24 }
  0x14   :  { %520 = vmatpush3.bf16.msra.mxu1 %v559_v18  ;;  %537 = vmatprep.subr.bf16.mxu0 %v572_v0 }
  0x15   :  { %521 = vmatprep.subr.bf16.mxu1 %v572_v0 }
  0x17   :  { %538 = vmatpush3.bf16.msra.mxu0 %v566_v25 }
  0x18   :  { %522 = vmatpush3.bf16.msra.mxu1 %v560_v19  ;;  %539 = vmatprep.subr.bf16.mxu0 %v572_v0 }
  0x19   :  { %523 = vmatprep.subr.bf16.mxu1 %v572_v0 }
  0x1b   :  { %540 = vmatpush3.bf16.msra.mxu0 %v567_v26 }
  0x1c   :  { %524 = vmatpush3.bf16.msra.mxu1 %v561_v20  ;;  %541 = vmatprep.subr.bf16.mxu0 %v572_v0 }
  0x1d   :  { %525 = vmatprep.subr.bf16.mxu1 %v572_v0 }
  0x1f   :  { %542 = vmatpush3.bf16.msra.mxu0 %v568_v27 }
  0x20   :  { %526 = vmatpush3.bf16.msra.mxu1 %v562_v21  ;;  %543 = vmatprep.subr.bf16.mxu0 %v572_v0 }
  0x21   :  { %527 = vmatprep.subr.bf16.mxu1 %v572_v0 }
  0x23   :  { %544 = vmatpush3.bf16.msra.mxu0 %v569_v50 }
  0x24   :  { %528 = vmatpush3.bf16.msra.mxu1 %v563_v22  ;;  %545 = vmatprep.subr.bf16.mxu0 %v572_v0 }
  0x27   :  { %546 = vmatpush3.bf16.msra.mxu0 %v570_v51 }
  0x28   :  { %547 = vmatprep.subr.bf16.mxu0 %v572_v0 }
  0x2b   :  { %548 = vmatpush3.bf16.msra.mxu0 %v571_v52 }
  0xc6   :  { %v93_v28 = vpop.f32.mrf.mxu0 }
  0xc7   :  { %v144_v29 = vpop.f32.mrf.mxu1 }
  0xc8   :  { %v499_v30 = vpop.f32.mrf.mxu0  ;;  %v145_v35 = vadd.f32 %v144_v29, %v93_v28 }
  0xc9   :  { %v505_v31 = vpop.f32.mrf.mxu1 }
  0xca   :  { %v96_v32 = vpop.f32.mrf.mxu0 }
  0xcb   :  { %v147_v33 = vpop.f32.mrf.mxu1 }
  0xcc   :  { %v500_v34 = vpop.f32.mrf.mxu0  ;;  %v148_v41 = vadd.f32 %v147_v33, %v96_v32 }
  0xcd   :  { %v506_v36 = vpop.f32.mrf.mxu1 }
  0xce   :  { %v194_v37 = vpop.f32.mrf.mxu0 }
  0xcf   :  { %v201_v38 = vadd.f32 %v194_v37, %v145_v35 }
  0xd0   :  { %v511_v40 = vpop.f32.mrf.mxu0 }
  0xd1   :  { %v210_v43 = vadd.f32 %v452_v39, %v201_v38 }
  0xd2   :  { %v197_v42 = vpop.f32.mrf.mxu0 }
  0xd3   :  { %v202_v44 = vadd.f32 %v197_v42, %v148_v41  ;;  %v212_v47 = vmax.f32 %v210_v43, 0.0 }
  0xd4   :  { %v512_v45 = vpop.f32.mrf.mxu0 }
  0xd5   :  { %v211_v46 = vadd.f32 %v452_v39, %v202_v44 }
  0xd7   :  { %v213_v48 = vmax.f32 %v211_v46, 0.0 }
  0xd9   :  { %v214_v49 = vpack.c.bf16 %v213_v48, %v212_v47 }
  0xdb   :  { %530 = vmatmul.mubr.bf16.vlgmr.msra.gmra.mxu1 %v214_v49 }
 0x19b   :  { %v320_v54 = vpop.f32.mrf.mxu1 }
 0x19c   :  { %v321_v56 = vadd.f32 %v453_v53, %v320_v54 }
 0x19d   :  { %v531_v55 = vpop.f32.mrf.mxu1 }
 0x19e   :  { %v327_v60 = vmax.f32 %v321_v56, 0.0 }
 0x19f   :  { %v323_v57 = vpop.f32.mrf.mxu1 }
 0x1a0   :  { %v324_v58 = vadd.f32 %v453_v53, %v323_v57 }
 0x1a1   :  { %v532_v59 = vpop.f32.mrf.mxu1 }
 0x1a2   :  { %v328_v61 = vmax.f32 %v324_v58, 0.0 }
 0x1a4   :  { %v329_v62 = vpack.c.bf16 %v328_v61, %v327_v60 }
 0x1a6   :  { %550 = vmatmul.mubr.bf16.vlgmr.msra.gmra.mxu0 %v329_v62 }
 0x266   :  { %v435_v0 = vpop.f32.mrf.mxu0 }
 0x267   :  { %v436_v1 = vadd.f32 %v462_v63, %v435_v0 }
 0x268   :  { %v551_v2 = vpop.f32.mrf.mxu0 }
 0x269   :  { %442 = vst [vmem:[%s764_s11] sm:$0xff] %v436_v1 }
 0x26a   :  { %v438_v3 = vpop.f32.mrf.mxu0 }
 0x26b   :  { %v439_v4 = vadd.f32 %v462_v63, %v438_v3 }
 0x26c   :  { %v552_v5 = vpop.f32.mrf.mxu0 }
 0x26d   :  { %443 = vst [vmem:[%s764_s11 + $0x8] sm:$0xff] %v439_v4 }

</bundles_post_ra>
